<compile_context>
chip_gen: v6e
topology: v6e:2x2x1
jax: 0.10.0
libtpu: 0.0.40
codegen_flags: <defaults>
</compile_context>

<pallas_src>
import jax
import jax.numpy as jnp
from jax.experimental import pallas as pl
from jax.experimental.pallas import tpu as pltpu

# ----------------------------- configuration ---------------------------------
B = 8                 # batch size (8 sublanes -> full vreg sublane occupancy)
C, H, W = 4, 16, 16   # image channels / spatial (NCHW); flattened dim = 1024
SEQ = 8               # text sequence length
CONTEXT_LEN = 8       # text encoder context length
VOCAB = 128           # token vocabulary size (lane-dense)
TEXT_EMB = 128        # text encoder embedding dim (lane-dense)
EMB = 128             # CLIP joint embedding dim (lane-dense)
INIT_TEMPERATURE = 1.0 / 0.07
LN_EPS = 1e-5
L2_EPS = 1e-12


# ------------------------------ fused Pallas kernel ----------------------------
def _clip_fused_kernel(x_img_ref, img_w_ref, eot_oh_ref, emb_ref, ln_g_ref, ln_b_ref,
                       proj_ref, temp_ref, image_logits_ref):
    f32 = jnp.float32

    # ---- image encoder stand-in: flatten + linear projection (single native bf16 MXU pass)
    # TODO(synk): real ResNet50 backbone lives outside this module; stand-in is linear.
    img_feat = jnp.dot(x_img_ref[...], img_w_ref[...],
                       preferred_element_type=f32)                       # [B, EMB]

    # ---- encode_text (EOT-commuted): gather ONLY the EOT token embedding per row,
    # as a one-hot @ table matmul on the MXU.  Valid because the transformer blocks
    # are identity stand-ins, so EOT selection commutes with the gather and LayerNorm.
    # TODO(synk): GPT2/Llama2 trf_blocks are identity stand-ins; revert to the
    # full-sequence path once real blocks are inserted.
    x_eot = jnp.dot(eot_oh_ref[...], emb_ref[...],
                    preferred_element_type=f32)                          # [B, TEXT_EMB]

    # ---- text_norm: LayerNorm over the feature dim, one-pass statistics ----------
    inv_n = 1.0 / x_eot.shape[-1]
    mean = jnp.sum(x_eot, axis=-1, keepdims=True) * inv_n
    ex2 = jnp.sum(x_eot * x_eot, axis=-1, keepdims=True) * inv_n
    var = ex2 - mean * mean
    x_ln = (x_eot - mean) * jax.lax.rsqrt(var + LN_EPS) * ln_g_ref[...] + ln_b_ref[...]

    # ---- text projection ----------------------------------------------------------
    txt_feat = jnp.dot(x_ln, proj_ref[...], preferred_element_type=f32)  # [B, EMB]

    # ---- CLIP head: L2 normalize; fold exp(temperature) into the image operand -----
    scale = jnp.exp(temp_ref[0] * jnp.ones((1, 1), f32))     # EUP exp on a 1-elem vreg
    inv_img = jax.lax.rsqrt(jnp.sum(img_feat * img_feat, axis=1, keepdims=True) + L2_EPS)
    inv_txt = jax.lax.rsqrt(jnp.sum(txt_feat * txt_feat, axis=1, keepdims=True) + L2_EPS)
    img_n = img_feat * (inv_img * scale)                     # temperature folded here
    txt_n = txt_feat * inv_txt
    # image_logits = img_n @ txt_n.T (contraction on dim 1 of both; no XLU transpose)
    image_logits_ref[...] = jax.lax.dot_general(
        img_n, txt_n, (((1,), (1,)), ((), ())), preferred_element_type=f32)  # [B, B]


def _full_spec(shape):
    return pl.BlockSpec(shape, lambda *_: (0,) * len(shape))


def pallas_clip_fused(x_img, img_w, eot_onehot, tok_emb, ln_g, ln_b, text_proj,
                      temperature):
    """Single fused pallas_call for the whole CLIP forward pass; returns image_logits."""
    b, flat = x_img.shape
    emb = img_w.shape[1]
    vocab, text_emb = tok_emb.shape
    return pl.pallas_call(
        _clip_fused_kernel,
        out_shape=jax.ShapeDtypeStruct((b, b), jnp.float32),       # image_logits
        grid=(1,),
        in_specs=[
            _full_spec((b, flat)),                                  # flattened image (bf16)
            _full_spec((flat, emb)),                                # image projection (bf16)
            _full_spec((b, vocab)),                                 # EOT one-hot selector
            _full_spec((vocab, text_emb)),                          # token embedding table
            _full_spec((1, text_emb)),                              # LayerNorm gamma
            _full_spec((1, text_emb)),                              # LayerNorm beta
            _full_spec((text_emb, emb)),                            # text projection
            pl.BlockSpec(memory_space=pltpu.MemorySpace.SMEM),      # temperature scalar
        ],
        out_specs=_full_spec((b, b)),
        compiler_params=pltpu.CompilerParams(dimension_semantics=("parallel",)),
    )(x_img, img_w, eot_onehot, tok_emb, ln_g, ln_b, text_proj, temperature)


# ------------------------------- parameters -----------------------------------
def init_params(key):
    k_img, k_tok, k_proj = jax.random.split(key, 3)
    flat = C * H * W
    return {
        # stand-in image encoder: flatten + linear to EMB, stored bf16 (dominant DMA)
        "img_w": (jax.random.normal(k_img, (flat, EMB), jnp.float32)
                  * (flat ** -0.5)).astype(jnp.bfloat16),
        # text token embedding table
        "tok_emb": jax.random.normal(k_tok, (VOCAB, TEXT_EMB), jnp.float32) * 0.02,
        # text_norm (LayerNorm) affine params
        "ln_g": jnp.ones((1, TEXT_EMB), jnp.float32),
        "ln_b": jnp.zeros((1, TEXT_EMB), jnp.float32),
        # text_projection ~ Normal(0, text_emb_dim ** -0.5)
        "text_proj": jax.random.normal(k_proj, (TEXT_EMB, EMB), jnp.float32)
        * (TEXT_EMB ** -0.5),
        # temperature parameter = log(init_temperature); forward uses exp(temperature)
        "temperature": jnp.full((1,), jnp.log(INIT_TEMPERATURE), jnp.float32),
    }


# ------------------------------- forward pass ----------------------------------
def clip_forward(params, text_tokens, image_nchw):
    b = text_tokens.shape[0]
    # image encoder input: flatten NCHW, bf16 activations (layout/dtype prep only)
    x_img = image_nchw.reshape(b, -1).astype(jnp.bfloat16)            # [B, C*H*W]
    # text tokens: context crop; EOT token = token at argmax position (== max token id)
    toks = text_tokens[:, -CONTEXT_LEN:]                              # [B, T]
    # TODO(synk): identity trf_blocks let EOT selection commute with the gather + LN,
    # so only the B EOT tokens enter the kernel; revert for real transformer blocks.
    eot_tok = jnp.max(toks, axis=-1)                                  # [B]
    eot_onehot = jax.nn.one_hot(eot_tok, VOCAB, dtype=jnp.float32)    # [B, VOCAB]
    image_logits = pallas_clip_fused(
        x_img, params["img_w"], eot_onehot, params["tok_emb"],
        params["ln_g"], params["ln_b"], params["text_proj"], params["temperature"])
    # PyTorch: text_logits = image_logits.T (a view) — exactly transpose-equal.
    text_logits = image_logits.T
    return text_logits, image_logits


# --------------------------- pure-JAX reference --------------------------------
def clip_forward_ref(params, text_tokens, image_nchw):
    hi = jax.lax.Precision.HIGHEST
    f32 = jnp.float32
    b = text_tokens.shape[0]
    # mirror the kernel's bf16 image path (weights are stored in bf16)
    x_img = image_nchw.reshape(b, -1).astype(jnp.bfloat16).astype(f32)
    image_features = jnp.dot(x_img, params["img_w"].astype(f32), precision=hi)
    toks = text_tokens[:, -CONTEXT_LEN:]
    x = jnp.take(params["tok_emb"], toks, axis=0)                     # [B, T, TEXT_EMB]
    mean = jnp.mean(x, -1, keepdims=True)
    var = jnp.mean((x - mean) ** 2, -1, keepdims=True)
    x = (x - mean) / jnp.sqrt(var + LN_EPS) * params["ln_g"] + params["ln_b"]
    eot_idx = jnp.argmax(toks, axis=-1)
    pooled = jnp.take_along_axis(x, eot_idx[:, None, None], axis=1)[:, 0, :]
    text_features = jnp.dot(pooled, params["text_proj"], precision=hi)
    img_n = image_features / jnp.linalg.norm(image_features, axis=1, keepdims=True)
    txt_n = text_features / jnp.linalg.norm(text_features, axis=1, keepdims=True)
    image_logits = jnp.dot(img_n, txt_n.T, precision=hi) * jnp.exp(params["temperature"][0])
    return image_logits.T, image_logits


# ---------------------------------- main ---------------------------------------
if __name__ == "__main__":
    key = jax.random.PRNGKey(0)
    k_params, k_img, k_txt = jax.random.split(key, 3)

    params = init_params(k_params)
    image_input = jax.random.normal(k_img, (B, C, H, W), jnp.float32)     # NCHW
    text_tokens = jax.random.randint(k_txt, (B, SEQ), 0, VOCAB, jnp.int32)

    text_logits, image_logits = jax.jit(clip_forward)(params, text_tokens, image_input)
    jax.block_until_ready((text_logits, image_logits))

    assert text_logits.shape == (B, B) and image_logits.shape == (B, B)
    assert bool(jnp.isfinite(text_logits).all()) and bool(jnp.isfinite(image_logits).all())
    assert bool(jnp.allclose(text_logits, image_logits.T))

    ref_text, ref_image = clip_forward_ref(params, text_tokens, image_input)
    assert bool(jnp.allclose(image_logits, ref_image, atol=1e-2, rtol=1e-2))
    assert bool(jnp.allclose(text_logits, ref_text, atol=1e-2, rtol=1e-2))

    print("KERNEL_OK")
</pallas_src>

<mosaic_0001>
module attributes {stable_mosaic.version = 11 : i64} {
  func.func @_clip_fused_kernel(%arg0: i32, %arg1: memref<8x1024xbf16, #tpu.memory_space<vmem>>, %arg2: memref<1024x128xbf16, #tpu.memory_space<vmem>>, %arg3: memref<8x128xf32, #tpu.memory_space<vmem>>, %arg4: memref<128x128xf32, #tpu.memory_space<vmem>>, %arg5: memref<1x128xf32, #tpu.memory_space<vmem>>, %arg6: memref<1x128xf32, #tpu.memory_space<vmem>>, %arg7: memref<128x128xf32, #tpu.memory_space<vmem>>, %arg8: memref<1xf32, #tpu.memory_space<smem>>, %arg9: memref<8x8xf32, #tpu.memory_space<vmem>>) attributes {dimension_semantics = [#tpu.dimension_semantics<parallel>], iteration_bounds = array<i64: 1>, scalar_prefetch = 0 : i64, scratch_operands = 0 : i64, tpu.core_type = #tpu.core_type<tc>, window_params = [{pipeline_mode = #tpu.pipeline_mode<synchronous>, transform_indices = @transform_0, window_bounds = array<i64: 8, 1024>}, {pipeline_mode = #tpu.pipeline_mode<synchronous>, transform_indices = @transform_1, window_bounds = array<i64: 1024, 128>}, {pipeline_mode = #tpu.pipeline_mode<synchronous>, transform_indices = @transform_2, window_bounds = array<i64: 8, 128>}, {pipeline_mode = #tpu.pipeline_mode<synchronous>, transform_indices = @transform_3, window_bounds = array<i64: 128, 128>}, {pipeline_mode = #tpu.pipeline_mode<synchronous>, transform_indices = @transform_4, window_bounds = array<i64: 1, 128>}, {pipeline_mode = #tpu.pipeline_mode<synchronous>, transform_indices = @transform_5, window_bounds = array<i64: 1, 128>}, {pipeline_mode = #tpu.pipeline_mode<synchronous>, transform_indices = @transform_6, window_bounds = array<i64: 128, 128>}, {transform_indices = @transform_7, window_bounds = array<i64: 1>}, {pipeline_mode = #tpu.pipeline_mode<synchronous>, transform_indices = @transform_8, window_bounds = array<i64: 8, 8>}]} {
    %c0 = arith.constant 0 : index
    %c0_0 = arith.constant 0 : index
    %0 = vector.load %arg1[%c0, %c0_0] : memref<8x1024xbf16, #tpu.memory_space<vmem>>, vector<8x1024xbf16>
    %c0_1 = arith.constant 0 : index
    %c0_2 = arith.constant 0 : index
    %1 = vector.load %arg2[%c0_1, %c0_2] : memref<1024x128xbf16, #tpu.memory_space<vmem>>, vector<1024x128xbf16>
    %cst = arith.constant dense<0.000000e+00> : vector<8x128xf32>
    %2 = tpu.matmul %0, %1, %cst {dimension_numbers = #tpu.dot_dimension_numbers<[1], [0], [0], [1], [0, 0, 1, 1], [], []>} : vector<8x1024xbf16>, vector<1024x128xbf16>, vector<8x128xf32> -> vector<8x128xf32>
    %c0_3 = arith.constant 0 : index
    %c0_4 = arith.constant 0 : index
    %3 = vector.load %arg3[%c0_3, %c0_4] : memref<8x128xf32, #tpu.memory_space<vmem>>, vector<8x128xf32>
    %c0_5 = arith.constant 0 : index
    %c0_6 = arith.constant 0 : index
    %4 = vector.load %arg4[%c0_5, %c0_6] : memref<128x128xf32, #tpu.memory_space<vmem>>, vector<128x128xf32>
    %cst_7 = arith.constant dense<0.000000e+00> : vector<8x128xf32>
    %5 = tpu.matmul %3, %4, %cst_7 {dimension_numbers = #tpu.dot_dimension_numbers<[1], [0], [0], [1], [0, 0, 1, 1], [], []>} : vector<8x128xf32>, vector<128x128xf32>, vector<8x128xf32> -> vector<8x128xf32>
    %cst_8 = arith.constant dense<0.000000e+00> : vector<8xf32>
    %6 = vector.multi_reduction <add>, %5, %cst_8 [1] : vector<8x128xf32> to vector<8xf32>
    %7 = vector.shape_cast %6 : vector<8xf32> to vector<8x1xf32>
    %cst_9 = arith.constant 7.812500e-03 : f32
    %8 = vector.broadcast %cst_9 : f32 to vector<8x1xf32>
    %9 = arith.mulf %7, %8 : vector<8x1xf32>
    %10 = arith.mulf %5, %5 : vector<8x128xf32>
    %cst_10 = arith.constant dense<0.000000e+00> : vector<8xf32>
    %11 = vector.multi_reduction <add>, %10, %cst_10 [1] : vector<8x128xf32> to vector<8xf32>
    %12 = vector.shape_cast %11 : vector<8xf32> to vector<8x1xf32>
    %cst_11 = arith.constant 7.812500e-03 : f32
    %13 = vector.broadcast %cst_11 : f32 to vector<8x1xf32>
    %14 = arith.mulf %12, %13 : vector<8x1xf32>
    %15 = arith.mulf %9, %9 : vector<8x1xf32>
    %16 = arith.subf %14, %15 : vector<8x1xf32>
    %17 = vector.broadcast %9 : vector<8x1xf32> to vector<8x128xf32>
    %18 = arith.subf %5, %17 : vector<8x128xf32>
    %cst_12 = arith.constant 9.99999974E-6 : f32
    %19 = vector.broadcast %cst_12 : f32 to vector<8x1xf32>
    %20 = arith.addf %16, %19 : vector<8x1xf32>
    %21 = math.rsqrt %20 : vector<8x1xf32>
    %22 = vector.broadcast %21 : vector<8x1xf32> to vector<8x128xf32>
    %23 = arith.mulf %18, %22 : vector<8x128xf32>
    %c0_13 = arith.constant 0 : index
    %c0_14 = arith.constant 0 : index
    %24 = vector.load %arg5[%c0_13, %c0_14] : memref<1x128xf32, #tpu.memory_space<vmem>>, vector<1x128xf32>
    %25 = vector.broadcast %24 : vector<1x128xf32> to vector<8x128xf32>
    %26 = arith.mulf %23, %25 : vector<8x128xf32>
    %c0_15 = arith.constant 0 : index
    %c0_16 = arith.constant 0 : index
    %27 = vector.load %arg6[%c0_15, %c0_16] : memref<1x128xf32, #tpu.memory_space<vmem>>, vector<1x128xf32>
    %28 = vector.broadcast %27 : vector<1x128xf32> to vector<8x128xf32>
    %29 = arith.addf %26, %28 : vector<8x128xf32>
    %c0_17 = arith.constant 0 : index
    %c0_18 = arith.constant 0 : index
    %30 = vector.load %arg7[%c0_17, %c0_18] : memref<128x128xf32, #tpu.memory_space<vmem>>, vector<128x128xf32>
    %cst_19 = arith.constant dense<0.000000e+00> : vector<8x128xf32>
    %31 = tpu.matmul %29, %30, %cst_19 {dimension_numbers = #tpu.dot_dimension_numbers<[1], [0], [0], [1], [0, 0, 1, 1], [], []>} : vector<8x128xf32>, vector<128x128xf32>, vector<8x128xf32> -> vector<8x128xf32>
    %c0_20 = arith.constant 0 : index
    %32 = memref.load %arg8[%c0_20] : memref<1xf32, #tpu.memory_space<smem>>
    %cst_21 = arith.constant 1.000000e+00 : f32
    %33 = vector.broadcast %cst_21 : f32 to vector<1x1xf32>
    %34 = vector.broadcast %32 : f32 to vector<1x1xf32>
    %35 = arith.mulf %34, %33 : vector<1x1xf32>
    %36 = math.exp %35 : vector<1x1xf32>
    %37 = arith.mulf %2, %2 : vector<8x128xf32>
    %cst_22 = arith.constant dense<0.000000e+00> : vector<8xf32>
    %38 = vector.multi_reduction <add>, %37, %cst_22 [1] : vector<8x128xf32> to vector<8xf32>
    %39 = vector.shape_cast %38 : vector<8xf32> to vector<8x1xf32>
    %cst_23 = arith.constant 9.99999996E-13 : f32
    %40 = vector.broadcast %cst_23 : f32 to vector<8x1xf32>
    %41 = arith.addf %39, %40 : vector<8x1xf32>
    %42 = math.rsqrt %41 : vector<8x1xf32>
    %43 = arith.mulf %31, %31 : vector<8x128xf32>
    %cst_24 = arith.constant dense<0.000000e+00> : vector<8xf32>
    %44 = vector.multi_reduction <add>, %43, %cst_24 [1] : vector<8x128xf32> to vector<8xf32>
    %45 = vector.shape_cast %44 : vector<8xf32> to vector<8x1xf32>
    %cst_25 = arith.constant 9.99999996E-13 : f32
    %46 = vector.broadcast %cst_25 : f32 to vector<8x1xf32>
    %47 = arith.addf %45, %46 : vector<8x1xf32>
    %48 = math.rsqrt %47 : vector<8x1xf32>
    %49 = vector.broadcast %36 : vector<1x1xf32> to vector<8x1xf32>
    %50 = arith.mulf %42, %49 : vector<8x1xf32>
    %51 = vector.broadcast %50 : vector<8x1xf32> to vector<8x128xf32>
    %52 = arith.mulf %2, %51 : vector<8x128xf32>
    %53 = vector.broadcast %48 : vector<8x1xf32> to vector<8x128xf32>
    %54 = arith.mulf %31, %53 : vector<8x128xf32>
    %cst_26 = arith.constant dense<0.000000e+00> : vector<8x8xf32>
    %55 = tpu.matmul %52, %54, %cst_26 {dimension_numbers = #tpu.dot_dimension_numbers<[1], [1], [0], [0], [0, 0, 1, 0], [], []>} : vector<8x128xf32>, vector<8x128xf32>, vector<8x8xf32> -> vector<8x8xf32>
    %c0_27 = arith.constant 0 : index
    %c0_28 = arith.constant 0 : index
    %56 = vector.load %arg9[%c0_27, %c0_28] : memref<8x8xf32, #tpu.memory_space<vmem>>, vector<8x8xf32>
    tpu.vector_store %arg9[%c0_27, %c0_28], %55 {strides = array<i32>} : memref<8x8xf32, #tpu.memory_space<vmem>>, vector<8x8xf32>,
    return
  }
  func.func @transform_0(%arg0: i32) -> (i32, i32) {
    %c0_i32 = arith.constant 0 : i32
    %c0_i32_0 = arith.constant 0 : i32
    %c0_i32_1 = arith.constant 0 : i32
    return %c0_i32, %c0_i32_0 : i32, i32
  }
  func.func @transform_1(%arg0: i32) -> (i32, i32) {
    %c0_i32 = arith.constant 0 : i32
    %c0_i32_0 = arith.constant 0 : i32
    %c0_i32_1 = arith.constant 0 : i32
    return %c0_i32, %c0_i32_0 : i32, i32
  }
  func.func @transform_2(%arg0: i32) -> (i32, i32) {
    %c0_i32 = arith.constant 0 : i32
    %c0_i32_0 = arith.constant 0 : i32
    %c0_i32_1 = arith.constant 0 : i32
    return %c0_i32, %c0_i32_0 : i32, i32
  }
  func.func @transform_3(%arg0: i32) -> (i32, i32) {
    %c0_i32 = arith.constant 0 : i32
    %c0_i32_0 = arith.constant 0 : i32
    %c0_i32_1 = arith.constant 0 : i32
    return %c0_i32, %c0_i32_0 : i32, i32
  }
  func.func @transform_4(%arg0: i32) -> (i32, i32) {
    %c0_i32 = arith.constant 0 : i32
    %c0_i32_0 = arith.constant 0 : i32
    %c0_i32_1 = arith.constant 0 : i32
    return %c0_i32, %c0_i32_0 : i32, i32
  }
  func.func @transform_5(%arg0: i32) -> (i32, i32) {
    %c0_i32 = arith.constant 0 : i32
    %c0_i32_0 = arith.constant 0 : i32
    %c0_i32_1 = arith.constant 0 : i32
    return %c0_i32, %c0_i32_0 : i32, i32
  }
  func.func @transform_6(%arg0: i32) -> (i32, i32) {
    %c0_i32 = arith.constant 0 : i32
    %c0_i32_0 = arith.constant 0 : i32
    %c0_i32_1 = arith.constant 0 : i32
    return %c0_i32, %c0_i32_0 : i32, i32
  }
  func.func @transform_7(%arg0: i32) -> i32 {
    %c0_i32 = arith.constant 0 : i32
    %c0_i32_0 = arith.constant 0 : i32
    return %c0_i32 : i32
  }
  func.func @transform_8(%arg0: i32) -> (i32, i32) {
    %c0_i32 = arith.constant 0 : i32
    %c0_i32_0 = arith.constant 0 : i32
    %c0_i32_1 = arith.constant 0 : i32
    return %c0_i32, %c0_i32_0 : i32, i32
  }
}

</mosaic_0001>

<bundles_post_ra>
// kernel: clip_forward.1
= control target key start
LH: loop header
LB: loop body
LE: loop exit
PB: predicated region body
PF: predicated region fallthrough
CT: control target
= control target key end

     0   :  { %vm1386_vm0 = vmmov 0   ;;  %vm1024_vm1 = vcmask 64512   ;;  %s1797_s1 = inlined_call_operand.vmem [shape: bf16[1024,128], index: 1, kind: input, shape index: {}]   ;;  %s1798_s0 = inlined_call_operand.vmem [shape: bf16[8,1024], index: 0, kind: input, shape index: {}]   ;;  %s1799_s3 = inlined_call_operand.vmem [shape: f32[128,128], index: 3, kind: input, shape index: {}]   ;;  %s1800_s2 = inlined_call_operand.vmem [shape: f32[8,128], index: 2, kind: input, shape index: {}]   ;;  %s1801_s6 = inlined_call_operand.vmem [shape: f32[128,128], index: 6, kind: input, shape index: {}]   ;;  %s1802_s4 = inlined_call_operand.vmem [shape: f32[1,128], index: 4, kind: input, shape index: {}]   ;;  %s1803_s5 = inlined_call_operand.vmem [shape: f32[1,128], index: 5, kind: input, shape index: {}]   ;;  %s1804_s7 = inlined_call_operand.<no memory space> [shape: f32[1], index: 7, kind: input, shape index: {}]   ;;  %s1805_s8 = inlined_call_operand.vmem [shape: f32[8,8], index: 8, kind: output, shape index: {}]  }
   0x1   :  { %v1305_v0 = vld [vmem:[%s1797_s1 + $0x78] sm:$0xff]   ;;  %v1309_v4 = vld [vmem:[%s1797_s1 + $0x70] sm:$0xff]   ;;  %v1313_v8 = vld [vmem:[%s1797_s1 + $0x68] sm:$0xff]  }
   0x2   :  { %v1306_v1 = vld [vmem:[%s1797_s1 + $0xf8] sm:$0xff]   ;;  %1104 = vmatprep.subr.bf16.mxu0 %v1305_v0  ;;  %v1310_v5 = vld [vmem:[%s1797_s1 + $0xf0] sm:$0xff]   ;;  %v1314_v9 = vld [vmem:[%s1797_s1 + $0xe8] sm:$0xff]  }
   0x3   :  { %v1307_v2 = vld [vmem:[%s1797_s1 + $0x38] sm:$0xff]   ;;  %1126 = vmatprep.subr.bf16.mxu1 %v1306_v1  ;;  %v1311_v6 = vld [vmem:[%s1797_s1 + $0x30] sm:$0xff]   ;;  %v1315_v10 = vld [vmem:[%s1797_s1 + $0x28] sm:$0xff]  }
   0x4   :  { %v1308_v3 = vld [vmem:[%s1797_s1 + $0xb8] sm:$0xff]   ;;  %1105 = vmatpush3.bf16.msra.mxu0 %v1307_v2  ;;  %v1312_v7 = vld [vmem:[%s1797_s1 + $0xb0] sm:$0xff]   ;;  %v1316_v11 = vld [vmem:[%s1797_s1 + $0xa8] sm:$0xff]  }
   0x5   :  { %1127 = vmatpush3.bf16.msra.mxu1 %v1308_v3  ;;  %1106 = vmatprep.subr.bf16.mxu0 %v1309_v4  ;;  %v1317_v12 = vld [vmem:[%s1797_s1 + $0x60] sm:$0xff]   ;;  %v1321_v16 = vld [vmem:[%s1797_s1 + $0x58] sm:$0xff]   ;;  %v1325_v20 = vld [vmem:[%s1797_s1 + $0x50] sm:$0xff]  }
   0x6   :  { %1128 = vmatprep.subr.bf16.mxu1 %v1310_v5  ;;  %v1318_v13 = vld [vmem:[%s1797_s1 + $0xe0] sm:$0xff]   ;;  %v1322_v17 = vld [vmem:[%s1797_s1 + $0xd8] sm:$0xff]   ;;  %v1326_v21 = vld [vmem:[%s1797_s1 + $0xd0] sm:$0xff]  }
   0x7   :  { %v1319_v14 = vld [vmem:[%s1797_s1 + $0x20] sm:$0xff]   ;;  %v1323_v18 = vld [vmem:[%s1797_s1 + $0x18] sm:$0xff]   ;;  %v1327_v22 = vld [vmem:[%s1797_s1 + $0x10] sm:$0xff]  }
   0x8   :  { %1107 = vmatpush3.bf16.msra.mxu0 %v1311_v6  ;;  %v1320_v15 = vld [vmem:[%s1797_s1 + $0xa0] sm:$0xff]   ;;  %v1324_v19 = vld [vmem:[%s1797_s1 + $0x98] sm:$0xff]   ;;  %v1328_v23 = vld [vmem:[%s1797_s1 + $0x90] sm:$0xff]  }
   0x9   :  { %1129 = vmatpush3.bf16.msra.mxu1 %v1312_v7  ;;  %1108 = vmatprep.subr.bf16.mxu0 %v1313_v8  ;;  %v1329_v24 = vld [vmem:[%s1797_s1 + $0x48] sm:$0xff]   ;;  %v1333_v28 = vld [vmem:[%s1797_s1 + $0x40] sm:$0xff]   ;;  %v1341_v38 = vld [vmem:[%s1797_s1 + $0x178] sm:$0xff]  }
   0xa   :  { %1130 = vmatprep.subr.bf16.mxu1 %v1314_v9  ;;  %v1330_v25 = vld [vmem:[%s1797_s1 + $0xc8] sm:$0xff]   ;;  %v1334_v29 = vld [vmem:[%s1797_s1 + $0xc0] sm:$0xff]   ;;  %v1342_v39 = vld [vmem:[%s1797_s1 + $0x138] sm:$0xff]  }
   0xb   :  { %v1331_v26 = vld [vmem:[%s1797_s1 + $0x8] sm:$0xff]   ;;  %v1335_v30 = vld [vmem:[%s1797_s1] sm:$0xff]   ;;  %v1343_v40 = vld [vmem:[%s1797_s1 + $0x1f8] sm:$0xff]  }
   0xc   :  { %1109 = vmatpush3.bf16.msra.mxu0 %v1315_v10  ;;  %v1332_v27 = vld [vmem:[%s1797_s1 + $0x88] sm:$0xff]   ;;  %v1336_v31 = vld [vmem:[%s1797_s1 + $0x80] sm:$0xff]   ;;  %v1344_v41 = vld [vmem:[%s1797_s1 + $0x1b8] sm:$0xff]  }
   0xd   :  { %1131 = vmatpush3.bf16.msra.mxu1 %v1316_v11  ;;  %1110 = vmatprep.subr.bf16.mxu0 %v1317_v12  ;;  %v31_v32 = vld [vmem:[%s1798_s0] sm:$0xff]  ;;  %v32_v33 = vld [vmem:[%s1798_s0 + $0x8] sm:$0xff]  ;;  %v1345_v42 = vld [vmem:[%s1797_s1 + $0x170] sm:$0xff]   ;;  %v1385_v12 = vmov 0.0  }
   0xe   :  { %1132 = vmatprep.subr.bf16.mxu1 %v1318_v13  ;;  %v1030_v34 = vcombine.low %v31_v32, %v31_v32  ;;  %v1031_v35 = vcombine.high %v31_v32, %v31_v32  ;;  %v1032_v36 = vcombine.low %v32_v33, %v32_v33  ;;  %v1033_v37 = vcombine.high %v32_v33, %v32_v33  ;;  %v1346_v43 = vld [vmem:[%s1797_s1 + $0x130] sm:$0xff]   ;;  %v1349_v46 = vld [vmem:[%s1797_s1 + $0x168] sm:$0xff]   ;;  %v1353_v50 = vld [vmem:[%s1797_s1 + $0x160] sm:$0xff]  }
   0xf   :  { %v1347_v44 = vld [vmem:[%s1797_s1 + $0x1f0] sm:$0xff]   ;;  %v1350_v47 = vld [vmem:[%s1797_s1 + $0x128] sm:$0xff]   ;;  %v1354_v51 = vld [vmem:[%s1797_s1 + $0x120] sm:$0xff]  }
  0x10   :  { %1111 = vmatpush3.bf16.msra.mxu0 %v1319_v14  ;;  %607 = vmatprep.mubr.bf16.mxu0 %v1031_v35  ;;  %v1348_v45 = vld [vmem:[%s1797_s1 + $0x1b0] sm:$0xff]   ;;  %v1351_v48 = vld [vmem:[%s1797_s1 + $0x1e8] sm:$0xff]   ;;  %v1355_v52 = vld [vmem:[%s1797_s1 + $0x1e0] sm:$0xff]  }
  0x11   :  { %1133 = vmatpush3.bf16.msra.mxu1 %v1320_v15  ;;  %1112 = vmatprep.subr.bf16.mxu0 %v1321_v16  ;;  %v1352_v49 = vld [vmem:[%s1797_s1 + $0x1a8] sm:$0xff]   ;;  %v1356_v53 = vld [vmem:[%s1797_s1 + $0x1a0] sm:$0xff]   ;;  %v1357_v54 = vld [vmem:[%s1797_s1 + $0x158] sm:$0xff]  }
  0x12   :  { %1134 = vmatprep.subr.bf16.mxu1 %v1322_v17  ;;  %647 = vmatprep.mubr.bf16.mxu1 %v1033_v37  ;;  %v1358_v55 = vld [vmem:[%s1797_s1 + $0x118] sm:$0xff]   ;;  %v1361_v58 = vld [vmem:[%s1797_s1 + $0x150] sm:$0xff]   ;;  %v1365_v62 = vld [vmem:[%s1797_s1 + $0x148] sm:$0xff]  }
  0x13   :  { %v1359_v56 = vld [vmem:[%s1797_s1 + $0x1d8] sm:$0xff]   ;;  %v1362_v59 = vld [vmem:[%s1797_s1 + $0x110] sm:$0xff]   ;;  %v1366_v63 = vld [vmem:[%s1797_s1 + $0x108] sm:$0xff]  }
  0x14   :  { %1113 = vmatpush3.bf16.msra.mxu0 %v1323_v18  ;;  %v1360_v57 = vld [vmem:[%s1797_s1 + $0x198] sm:$0xff]   ;;  %v1363_v60 = vld [vmem:[%s1797_s1 + $0x1d0] sm:$0xff]   ;;  %v1367_v0 = vld [vmem:[%s1797_s1 + $0x1c8] sm:$0xff]  }
  0x15   :  { %1135 = vmatpush3.bf16.msra.mxu1 %v1324_v19  ;;  %1114 = vmatprep.subr.bf16.mxu0 %v1325_v20  ;;  %v1364_v61 = vld [vmem:[%s1797_s1 + $0x190] sm:$0xff]   ;;  %v1368_v1 = vld [vmem:[%s1797_s1 + $0x188] sm:$0xff]   ;;  %v1369_v2 = vld [vmem:[%s1797_s1 + $0x140] sm:$0xff]  }
  0x16   :  { %1136 = vmatprep.subr.bf16.mxu1 %v1326_v21  ;;  %v1370_v3 = vld [vmem:[%s1797_s1 + $0x100] sm:$0xff]   ;;  %v33_v5 = vld [vmem:[%s1798_s0 + $0x10] sm:$0xff]  ;;  %v34_v9 = vld [vmem:[%s1798_s0 + $0x18] sm:$0xff] }
  0x17   :  { %v1371_v4 = vld [vmem:[%s1797_s1 + $0x1c0] sm:$0xff]   ;;  %v1035_v6 = vcombine.high %v33_v5, %v33_v5  ;;  %v1034_v8 = vcombine.low %v33_v5, %v33_v5  ;;  %v1036_v10 = vcombine.low %v34_v9, %v34_v9  ;;  %v1037_v11 = vcombine.high %v34_v9, %v34_v9  ;;  %v751_v13 = vld [vmem:[%s1799_s3 + $0x78] sm:$0xff]  ;;  %v750_v14 = vld [vmem:[%s1799_s3 + $0x70] sm:$0xff] }
  0x18   :  { %1115 = vmatpush3.bf16.msra.mxu0 %v1327_v22  ;;  %v1374_v7 = vld [vmem:[%s1797_s1 + $0x180] sm:$0xff]   ;;  %v749_v15 = vld [vmem:[%s1799_s3 + $0x68] sm:$0xff]  ;;  %v747_v17 = vld [vmem:[%s1799_s3 + $0x58] sm:$0xff] }
  0x19   :  { %1137 = vmatpush3.bf16.msra.mxu1 %v1328_v23  ;;  %1116 = vmatprep.subr.bf16.mxu0 %v1329_v24  ;;  %v748_v16 = vld [vmem:[%s1799_s3 + $0x60] sm:$0xff]  ;;  %v746_v18 = vld [vmem:[%s1799_s3 + $0x50] sm:$0xff]  ;;  %v745_v19 = vld [vmem:[%s1799_s3 + $0x48] sm:$0xff] }
  0x1a   :  { %1138 = vmatprep.subr.bf16.mxu1 %v1330_v25  ;;  %v744_v20 = vld [vmem:[%s1799_s3 + $0x40] sm:$0xff]  ;;  %v743_v21 = vld [vmem:[%s1799_s3 + $0x38] sm:$0xff]  ;;  %v742_v22 = vld [vmem:[%s1799_s3 + $0x30] sm:$0xff] }
  0x1b   :  { %v741_v23 = vld [vmem:[%s1799_s3 + $0x28] sm:$0xff]  ;;  %v740_v24 = vld [vmem:[%s1799_s3 + $0x20] sm:$0xff]  ;;  %v739_v25 = vld [vmem:[%s1799_s3 + $0x18] sm:$0xff] }
  0x1c   :  { %1117 = vmatpush3.bf16.msra.mxu0 %v1331_v26  ;;  %v738_v26 = vld [vmem:[%s1799_s3 + $0x10] sm:$0xff] }
  0x1d   :  { %1139 = vmatpush3.bf16.msra.mxu1 %v1332_v27  ;;  %1118 = vmatprep.subr.bf16.mxu0 %v1333_v28  ;;  %v737_v27 = vld [vmem:[%s1799_s3 + $0x8] sm:$0xff]  ;;  %v736_v28 = vld [vmem:[%s1799_s3] sm:$0xff]  ;;  %v853_v5 = vld [vmem:[%s1801_s6 + $0x10] sm:$0xff] }
  0x1e   :  { %1140 = vmatprep.subr.bf16.mxu1 %v1334_v29  ;;  %v735_v29 = vld [vmem:[%s1800_s2] sm:$0xff] }
  0x20   :  { %1119 = vmatpush3.bf16.msra.mxu0 %v1335_v30  ;;  %v866_v30 = vld [vmem:[%s1801_s6 + $0x78] sm:$0xff] }
  0x21   :  { %1141 = vmatpush3.bf16.msra.mxu1 %v1336_v31  ;;  %1148 = vmatprep.subr.bf16.mxu0 %v1341_v38 }
  0x22   :  { %1170 = vmatprep.subr.bf16.mxu1 %v1343_v40 }
  0x23   :  { %608 = vmatmul.mubr.bf16.vlgmr.msra.gmra.mxu0 %v1030_v34 }
  0x24   :  { %648 = vmatmul.mubr.bf16.vlgmr.msra.gmra.mxu1 %v1032_v36  ;;  %1149 = vmatpush3.bf16.msra.mxu0 %v1342_v39 }
  0x25   :  { %1171 = vmatpush3.bf16.msra.mxu1 %v1344_v41  ;;  %1150 = vmatprep.subr.bf16.mxu0 %v1345_v42 }
  0x26   :  { %1172 = vmatprep.subr.bf16.mxu1 %v1347_v44  ;;  %687 = vmatprep.mubr.bf16.mxu0 %v1035_v6  ;;  %v852_v6 = vld [vmem:[%s1801_s6 + $0x8] sm:$0xff] }
  0x27   :  { %727 = vmatprep.mubr.bf16.mxu1 %v1037_v11 }
  0x28   :  { %1151 = vmatpush3.bf16.msra.mxu0 %v1346_v43 }
  0x29   :  { %1173 = vmatpush3.bf16.msra.mxu1 %v1348_v45  ;;  %1152 = vmatprep.subr.bf16.mxu0 %v1349_v46 }
  0x2a   :  { %1174 = vmatprep.subr.bf16.mxu1 %v1351_v48 }
  0x2c   :  { %1153 = vmatpush3.bf16.msra.mxu0 %v1350_v47 }
  0x2d   :  { %1175 = vmatpush3.bf16.msra.mxu1 %v1352_v49  ;;  %1154 = vmatprep.subr.bf16.mxu0 %v1353_v50 }
  0x2e   :  { %1176 = vmatprep.subr.bf16.mxu1 %v1355_v52 }
  0x30   :  { %1155 = vmatpush3.bf16.msra.mxu0 %v1354_v51 }
  0x31   :  { %1177 = vmatpush3.bf16.msra.mxu1 %v1356_v53  ;;  %1156 = vmatprep.subr.bf16.mxu0 %v1357_v54 }
  0x32   :  { %1178 = vmatprep.subr.bf16.mxu1 %v1359_v56 }
  0x34   :  { %1157 = vmatpush3.bf16.msra.mxu0 %v1358_v55 }
  0x35   :  { %1179 = vmatpush3.bf16.msra.mxu1 %v1360_v57  ;;  %1158 = vmatprep.subr.bf16.mxu0 %v1361_v58  ;;  %v865_v57 = vld [vmem:[%s1801_s6 + $0x70] sm:$0xff]  ;;  %v864_v58 = vld [vmem:[%s1801_s6 + $0x68] sm:$0xff] }
  0x36   :  { %1180 = vmatprep.subr.bf16.mxu1 %v1363_v60  ;;  %v862_v60 = vld [vmem:[%s1801_s6 + $0x58] sm:$0xff] }
  0x38   :  { %1159 = vmatpush3.bf16.msra.mxu0 %v1362_v59  ;;  %v863_v59 = vld [vmem:[%s1801_s6 + $0x60] sm:$0xff] }
  0x39   :  { %1181 = vmatpush3.bf16.msra.mxu1 %v1364_v61  ;;  %1160 = vmatprep.subr.bf16.mxu0 %v1365_v62  ;;  %v861_v61 = vld [vmem:[%s1801_s6 + $0x50] sm:$0xff]  ;;  %v860_v62 = vld [vmem:[%s1801_s6 + $0x48] sm:$0xff] }
  0x3a   :  { %1182 = vmatprep.subr.bf16.mxu1 %v1367_v0  ;;  %v858_v0 = vld [vmem:[%s1801_s6 + $0x38] sm:$0xff] }
  0x3c   :  { %1161 = vmatpush3.bf16.msra.mxu0 %v1366_v63  ;;  %v859_v63 = vld [vmem:[%s1801_s6 + $0x40] sm:$0xff] }
  0x3d   :  { %1183 = vmatpush3.bf16.msra.mxu1 %v1368_v1  ;;  %1162 = vmatprep.subr.bf16.mxu0 %v1369_v2  ;;  %v857_v1 = vld [vmem:[%s1801_s6 + $0x30] sm:$0xff]  ;;  %v856_v2 = vld [vmem:[%s1801_s6 + $0x28] sm:$0xff] }
  0x3e   :  { %1184 = vmatprep.subr.bf16.mxu1 %v1371_v4  ;;  %v854_v4 = vld [vmem:[%s1801_s6 + $0x18] sm:$0xff] }
  0x40   :  { %1163 = vmatpush3.bf16.msra.mxu0 %v1370_v3  ;;  %v855_v3 = vld [vmem:[%s1801_s6 + $0x20] sm:$0xff] }
  0x41   :  { %1185 = vmatpush3.bf16.msra.mxu1 %v1374_v7  ;;  %1228 = vmatprep.subr.mxu0 %v1385_v12  ;;  %v851_v7 = vld [vmem:[%s1801_s6] sm:$0xff] }
  0x42   :  { %1263 = vmatprep.subr.mxu1 %v1385_v12 }
  0x43   :  { %688 = vmatmul.mubr.bf16.vlgmr.msra.gmra.mxu0 %v1034_v8 }
  0x44   :  { %1229 = vmatpush3.msra.mxu0 %v751_v13  ;;  %728 = vmatmul.mubr.bf16.vlgmr.msra.gmra.mxu1 %v1036_v10 }
  0x45   :  { %1230 = vmatprep.subr.mxu0 %v1385_v12  ;;  %1260 = vmatprep.mubr.msk.f32.mxu0 %vm1386_vm0, %v1385_v12 }
  0x46   :  { %1231 = vmatpush3.msra.mxu0 %v750_v14  ;;  %1295 = vmatprep.mubr.msk.f32.mxu1 %vm1386_vm0, %v1385_v12 }
  0x47   :  { %1232 = vmatprep.subr.mxu0 %v1385_v12  ;;  %1264 = vmatpush3.msra.mxu1 %v866_v30 }
  0x48   :  { %1233 = vmatpush3.msra.mxu0 %v749_v15  ;;  %1265 = vmatprep.subr.mxu1 %v1385_v12 }
  0x49   :  { %1234 = vmatprep.subr.mxu0 %v1385_v12  ;;  %1266 = vmatpush3.msra.mxu1 %v865_v57 }
  0x4a   :  { %1235 = vmatpush3.msra.mxu0 %v748_v16  ;;  %1267 = vmatprep.subr.mxu1 %v1385_v12 }
  0x4b   :  { %1236 = vmatprep.subr.mxu0 %v1385_v12  ;;  %1268 = vmatpush3.msra.mxu1 %v864_v58 }
  0x4c   :  { %1237 = vmatpush3.msra.mxu0 %v747_v17  ;;  %1269 = vmatprep.subr.mxu1 %v1385_v12 }
  0x4d   :  { %1238 = vmatprep.subr.mxu0 %v1385_v12  ;;  %1270 = vmatpush3.msra.mxu1 %v863_v59 }
  0x4e   :  { %1239 = vmatpush3.msra.mxu0 %v746_v18  ;;  %1271 = vmatprep.subr.mxu1 %v1385_v12  ;;  %v1102_v18 = vld [vmem:[%s1802_s4] ss:$0 sm:$0xff] }
  0x4f   :  { %1240 = vmatprep.subr.mxu0 %v1385_v12  ;;  %1272 = vmatpush3.msra.mxu1 %v862_v60 }
  0x50   :  { %1241 = vmatpush3.msra.mxu0 %v745_v19  ;;  %1273 = vmatprep.subr.mxu1 %v1385_v12 }
  0x51   :  { %1242 = vmatprep.subr.mxu0 %v1385_v12  ;;  %1274 = vmatpush3.msra.mxu1 %v861_v61 }
  0x52   :  { %1243 = vmatpush3.msra.mxu0 %v744_v20  ;;  %1275 = vmatprep.subr.mxu1 %v1385_v12 }
  0x53   :  { %1244 = vmatprep.subr.mxu0 %v1385_v12  ;;  %1276 = vmatpush3.msra.mxu1 %v860_v62 }
  0x54   :  { %1245 = vmatpush3.msra.mxu0 %v743_v21  ;;  %1277 = vmatprep.subr.mxu1 %v1385_v12 }
  0x55   :  { %1246 = vmatprep.subr.mxu0 %v1385_v12  ;;  %1278 = vmatpush3.msra.mxu1 %v859_v63 }
  0x56   :  { %1247 = vmatpush3.msra.mxu0 %v742_v22  ;;  %1279 = vmatprep.subr.mxu1 %v1385_v12 }
  0x57   :  { %1248 = vmatprep.subr.mxu0 %v1385_v12  ;;  %1280 = vmatpush3.msra.mxu1 %v858_v0 }
  0x58   :  { %1249 = vmatpush3.msra.mxu0 %v741_v23  ;;  %1281 = vmatprep.subr.mxu1 %v1385_v12 }
  0x59   :  { %1250 = vmatprep.subr.mxu0 %v1385_v12  ;;  %1282 = vmatpush3.msra.mxu1 %v857_v1 }
  0x5a   :  { %1251 = vmatpush3.msra.mxu0 %v740_v24  ;;  %1283 = vmatprep.subr.mxu1 %v1385_v12 }
  0x5b   :  { %1252 = vmatprep.subr.mxu0 %v1385_v12  ;;  %1284 = vmatpush3.msra.mxu1 %v856_v2 }
  0x5c   :  { %1253 = vmatpush3.msra.mxu0 %v739_v25  ;;  %1285 = vmatprep.subr.mxu1 %v1385_v12 }
  0x5d   :  { %1254 = vmatprep.subr.mxu0 %v1385_v12  ;;  %1286 = vmatpush3.msra.mxu1 %v855_v3 }
  0x5e   :  { %1255 = vmatpush3.msra.mxu0 %v738_v26  ;;  %1287 = vmatprep.subr.mxu1 %v1385_v12  ;;  %v938_v26 = vstv %s1804_s7 }
  0x5f   :  { %1256 = vmatprep.subr.mxu0 %v1385_v12  ;;  %1288 = vmatpush3.msra.mxu1 %v854_v4 }
  0x60   :  { %1257 = vmatpush3.msra.mxu0 %v737_v27  ;;  %1289 = vmatprep.subr.mxu1 %v1385_v12 }
  0x61   :  { %1258 = vmatprep.subr.mxu0 %v1385_v12  ;;  %1290 = vmatpush3.msra.mxu1 %v853_v5 }
  0x62   :  { %1259 = vmatpush3.msra.mxu0 %v736_v28  ;;  %1291 = vmatprep.subr.mxu1 %v1385_v12 }
  0x63   :  { %1261 = vmatmul.mubr.f32.vlgmr.msra.gmra.mxu0 %v735_v29  ;;  %1298 = vmatprep.subr.mxu0 %v1385_v12  ;;  %v939_v29 = vmul.f32 1.442695, %v938_v26 }
  0x64   :  { %1300 = vmatprep.mubr.msk.f32.mxu0 %vm1386_vm0, %v1385_v12  ;;  %1292 = vmatpush3.msra.mxu1 %v852_v6 }
  0x65   :  { %1293 = vmatprep.subr.mxu1 %v1385_v12  ;;  %v1103_v12 = vld [vmem:[%s1803_s5] ss:$0 sm:$0xff] }
  0x66   :  { %1294 = vmatpush3.msra.mxu1 %v851_v7 }
  0xe3   :  { %v1120_v31 = vpop.f32.mrf.mxu0 }
  0xe4   :  { %v1142_v32 = vpop.f32.mrf.mxu1 }
  0xe5   :  { %v1121_v33 = vpop.f32.mrf.mxu0 }
  0xe6   :  { %v1143_v34 = vpop.f32.mrf.mxu1  ;;  %v1122_v35 = vadd.f32 %v1121_v33, %v1120_v31 }
  0xe7   :  { %v1144_v36 = vadd.f32 %v1143_v34, %v1142_v32  ;;  %v1123_v37 = vpop.f32.mrf.mxu0 }
  0xe8   :  { %v1145_v38 = vpop.f32.mrf.mxu1 }
  0xe9   :  { %v650_v39 = vadd.f32 %v1144_v36, %v1122_v35  ;;  %v1124_v40 = vpop.f32.mrf.mxu0 }
  0xea   :  { %v1146_v41 = vpop.f32.mrf.mxu1 }
 0x103   :  { %v1164_v42 = vpop.f32.mrf.mxu0 }
 0x104   :  { %v1186_v43 = vpop.f32.mrf.mxu1 }
 0x105   :  { %v1165_v44 = vpop.f32.mrf.mxu0 }
 0x106   :  { %v1166_v45 = vadd.f32 %v1165_v44, %v1164_v42  ;;  %v1187_v46 = vpop.f32.mrf.mxu1 }
 0x107   :  { %v1167_v47 = vpop.f32.mrf.mxu0  ;;  %v1188_v48 = vadd.f32 %v1187_v46, %v1186_v43 }
 0x108   :  { %v690_v49 = vadd.f32 %v1166_v45, %v650_v39  ;;  %v1189_v50 = vpop.f32.mrf.mxu1 }
 0x109   :  { %v1168_v51 = vpop.f32.mrf.mxu0 }
 0x10a   :  { %v1715_v52 = vadd.f32 %v1188_v48, %v690_v49  ;;  %v1190_v53 = vpop.f32.mrf.mxu1 }
 0x10c   :  { %v941_v25 = vmul.f32 %v1715_v52, %v1715_v52 }
 0x123   :  { %v1717_v54 = vpop.f32.mrf.mxu0 }
 0x124   :  { %822 = vadd.xlane.f32.xlu0 %v1717_v54  ;;  %v825_v56 = vmul.f32 %v1717_v54, %v1717_v54 }
 0x125   :  { %v1262_v55 = vpop.f32.mrf.mxu0 }
 0x128   :  { %826 = vadd.xlane.f32.xlu0 %v825_v56 }
 0x1ad   :  { %v823_v8 = vpop.xlane.xlu0 %822 }
 0x1ae   :  { %v824_v9 = vmul.f32 0.0078125, %v823_v8 }
 0x1b0   :  { %v829_v11 = vmul.f32 %v824_v9, %v824_v9  ;;  %v831_v16 = vsub.f32 %v1717_v54, %v824_v9 }
 0x1b1   :  { %v827_v10 = vpop.xlane.xlu0 %826 }
 0x1b2   :  { %v828_v13 = vmul.f32 0.0078125, %v827_v10 }
 0x1b4   :  { %v830_v14 = vsub.f32 %v828_v13, %v829_v11 }
 0x1b6   :  { %v832_v15 = vadd.f32 1e-05, %v830_v14 }
 0x1b8   :  { %1377 = vrsqrt.f32 %v832_v15 }
 0x1c5   :  { %v1378_v17 = vpop.eup %1377 }
 0x1c6   :  { %v834_v19 = vmul.f32 %v1378_v17, %v831_v16 }
 0x1c8   :  { %v842_v20 = vmul.f32 %v1102_v18, %v834_v19 }
 0x1ca   :  { %v850_v21 = vadd.f32 %v1103_v12, %v842_v20 }
 0x1cc   :  { %1296 = vmatmul.mubr.f32.vlgmr.msra.gmra.mxu1 %v850_v21 }
 0x28c   :  { %v933_v22 = vpop.f32.mrf.mxu1 }
 0x28d   :  { %v946_v23 = vmul.f32 %v933_v22, %v933_v22 }
 0x28e   :  { %v1297_v24 = vpop.f32.mrf.mxu1 }
 0x28f   :  { %947 = vadd.xlane.f32.xlu1 %v946_v23 }
 0x293   :  { %942 = vadd.xlane.f32.xlu1 %v941_v25 }
 0x318   :  { %v948_v27 = vpop.xlane.xlu1 %947 }
 0x319   :  { %v949_v28 = vadd.f32 1e-12, %v948_v27 }
 0x31b   :  { %1379 = vrsqrt.f32 %v949_v28 }
 0x31c   :  { %v943_v30 = vpop.xlane.xlu1 %942  ;;  %1381 = vpow2.f32 %v939_v29 }
 0x31d   :  { %v944_v31 = vadd.f32 1e-12, %v943_v30 }
 0x31f   :  { %1383 = vrsqrt.f32 %v944_v31 }
 0x328   :  { %v1380_v32 = vpop.eup %1379 }
 0x329   :  { %v953_v33 = vmul.f32 %v1380_v32, %v933_v22  ;;  %v1382_v34 = vpop.eup %1381 }
 0x32b   :  { %1299 = vmatpush3.xpose.msra.mxu0 %v953_v33 }
 0x32c   :  { %v1384_v35 = vpop.eup %1383 }
 0x32d   :  { %v951_v36 = vmul.f32 %v1384_v35, %v1382_v34 }
 0x32f   :  { %v952_v37 = vmul.f32 %v951_v36, %v1715_v52 }
 0x331   :  { %1301 = vmatmul.mubr.f32.vlgmr.msra.gmra.mxu0 %v952_v37 }
 0x3f1   :  { %v1020_v38 = vpop.f32.mrf.mxu0 }
 0x3f2   :  { %1025 = vst.msk [vmem:[%s1805_s8] sm:$0xff] %vm1024_vm1, %v1020_v38 }
 0x3f3   :  { %v1302_v39 = vpop.f32.mrf.mxu0 }

</bundles_post_ra>
